<compile_context>
chip_gen: v7x
topology: tpu7x:2x2x1
jax: 0.10.0
libtpu: 0.0.40
codegen_flags: <defaults>
</compile_context>

<pallas_src>
import functools

import jax
import jax.numpy as jnp
from jax.experimental import pallas as pl
from jax.experimental.pallas import tpu as pltpu


def _round_up(x: int, m: int) -> int:
    return ((x + m - 1) // m) * m


def _logreg_kernel(x_ref, w_ref, b_ref, o_ref, acc_ref):
    """Process one (TB, TF) tile of x against the resident weight row.

    x_ref  : (TB, TF)  input tile (VMEM)
    w_ref  : (1,  TF)  weight-row tile (VMEM, indexed only by the k axis)
    b_ref  : (1, 1)    bias scalar (SMEM)
    o_ref  : (TB, 128) lane-broadcast sigmoid output tile (VMEM)
    acc_ref: (TB, 128) f32 per-lane partial-sum accumulator (VMEM scratch)
    """
    k = pl.program_id(1)

    @pl.when(k == 0)
    def _init():
        acc_ref[...] = jnp.zeros_like(acc_ref)

    tb, tf = x_ref.shape
    n_chunks = tf // 128

    # VPU multiply + per-lane accumulate; upcast to f32 so accumulation over a
    # large F keeps full precision. No cross-lane work in the hot loop.
    partial = (x_ref[:, 0:128].astype(jnp.float32)
               * w_ref[:, 0:128].astype(jnp.float32))
    for c in range(1, n_chunks):
        lo = c * 128
        partial = partial + (x_ref[:, lo:lo + 128].astype(jnp.float32)
                             * w_ref[:, lo:lo + 128].astype(jnp.float32))
    acc_ref[...] += partial

    @pl.when(k == pl.num_programs(1) - 1)
    def _finalize():
        # Single XLU cross-lane reduce, bias added exactly once, sigmoid (EUP).
        s = jnp.sum(acc_ref[...], axis=-1, keepdims=True) + b_ref[0, 0]  # (TB,1)
        y = jax.nn.sigmoid(s).astype(o_ref.dtype)
        # Lane-broadcast so the store is a full-width, unmasked vst.
        o_ref[...] = jnp.broadcast_to(y, o_ref.shape)


@functools.partial(jax.jit, static_argnames=("block_b", "block_f"))
def logistic_forward(x, weight, bias, *, block_b: int = 512, block_f: int = 1024):
    """sigmoid(x @ weight.T + bias); x:(B,F), weight:(1,F), bias:(1,) -> (B,1)."""
    B, F = x.shape
    w = jnp.reshape(weight, (1, F))

    # Tile sizes are multiples of 128, clamped to the padded problem size.
    # Zero padding over F does not change the dot product; padded batch rows
    # are sliced off at the end.
    tb = min(block_b, _round_up(B, 128))
    tf = min(block_f, _round_up(F, 128))
    b_pad = _round_up(B, tb)
    f_pad = _round_up(F, tf)

    x_p = jnp.zeros((b_pad, f_pad), x.dtype).at[:B, :F].set(x)
    w_p = jnp.zeros((1, f_pad), w.dtype).at[:, :F].set(w)
    b_smem = jnp.asarray(bias, jnp.float32).reshape(1, 1)

    nb = b_pad // tb
    nk = f_pad // tf

    out = pl.pallas_call(
        _logreg_kernel,
        out_shape=jax.ShapeDtypeStruct((b_pad, 128), x.dtype),
        grid_spec=pltpu.PrefetchScalarGridSpec(
            num_scalar_prefetch=0,
            grid=(nb, nk),                                          # reduction axis last
            in_specs=[
                pl.BlockSpec((tb, tf), lambda i, k: (i, k)),        # x tile
                pl.BlockSpec((1, tf), lambda i, k: (0, k)),         # weight row (k only)
                pl.BlockSpec(memory_space=pltpu.MemorySpace.SMEM),  # bias scalar
            ],
            out_specs=pl.BlockSpec((tb, 128), lambda i, k: (i, 0)),
            scratch_shapes=[pltpu.VMEM((tb, 128), jnp.float32)],
        ),
        compiler_params=pltpu.CompilerParams(
            dimension_semantics=("parallel", "arbitrary"),
            vmem_limit_bytes=32 * 1024 * 1024,
        ),
    )(x_p, w_p, b_smem)

    return out[:B, 0:1]


if __name__ == "__main__":
    key = jax.random.PRNGKey(0)
    kx, kw, kb, kx2, kw2 = jax.random.split(key, 5)

    # Small logistic-regression-style shapes consistent with the module.
    batch, n_features = 8, 30
    x = jax.random.normal(kx, (batch, n_features), jnp.float32)
    weight = 0.1 * jax.random.normal(kw, (1, n_features), jnp.float32)
    bias = 0.1 * jax.random.normal(kb, (1,), jnp.float32)

    y = jax.block_until_ready(logistic_forward(x, weight, bias))
    y_ref = jax.nn.sigmoid(jnp.sum(x * weight, axis=-1, keepdims=True) + bias)
    assert y.shape == (batch, 1)
    assert float(jnp.max(jnp.abs(y - y_ref))) < 1e-5, "small-case mismatch"

    # Larger case exercising the tiled (multi-block) batch and reduction axes.
    B2, F2 = 1024, 4096
    x2 = jax.random.normal(kx2, (B2, F2), jnp.float32)
    w2 = 0.02 * jax.random.normal(kw2, (1, F2), jnp.float32)
    y2 = jax.block_until_ready(logistic_forward(x2, w2, bias))
    y2_ref = jax.nn.sigmoid(jnp.sum(x2 * w2, axis=-1, keepdims=True) + bias)
    assert y2.shape == (B2, 1)
    assert float(jnp.max(jnp.abs(y2 - y2_ref))) < 1e-4, "large-case mismatch"

    print("KERNEL_OK")
</pallas_src>

<mosaic_0001>
module attributes {stable_mosaic.version = 11 : i64} {
  func.func @_logreg_kernel(%arg0: i32, %arg1: i32, %arg2: memref<128x128xf32, #tpu.memory_space<vmem>>, %arg3: memref<1x128xf32, #tpu.memory_space<vmem>>, %arg4: memref<1x1xf32, #tpu.memory_space<smem>>, %arg5: memref<128x128xf32, #tpu.memory_space<vmem>>, %arg6: memref<128x128xf32, #tpu.memory_space<vmem>>) attributes {dimension_semantics = [#tpu.dimension_semantics<parallel>, #tpu.dimension_semantics<arbitrary>], iteration_bounds = array<i64: 1, 1>, scalar_prefetch = 0 : i64, scratch_operands = 1 : i64, tpu.core_type = #tpu.core_type<tc>, window_params = [{transform_indices = @transform_0, window_bounds = array<i64: 128, 128>}, {transform_indices = @transform_1, window_bounds = array<i64: 1, 128>}, {transform_indices = @transform_2, window_bounds = array<i64: 1, 1>}, {transform_indices = @transform_3, window_bounds = array<i64: 128, 128>}]} {
    %c0_i32 = arith.constant 0 : i32
    %0 = arith.cmpi eq, %arg1, %c0_i32 : i32
    %1 = arith.extui %0 : i1 to i32
    %c0_i32_0 = arith.constant 0 : i32
    %2 = arith.cmpi ne, %1, %c0_i32_0 : i32
    scf.if %2 {
      %cst = arith.constant 0.000000e+00 : f32
      %13 = vector.broadcast %cst : f32 to vector<128x128xf32>
      %c0_10 = arith.constant 0 : index
      %c0_11 = arith.constant 0 : index
      %14 = vector.load %arg6[%c0_10, %c0_11] : memref<128x128xf32, #tpu.memory_space<vmem>>, vector<128x128xf32>
      tpu.vector_store %arg6[%c0_10, %c0_11], %13 {strides = array<i32>} : memref<128x128xf32, #tpu.memory_space<vmem>>, vector<128x128xf32>,
    } else {
    }
    %c0 = arith.constant 0 : index
    %c0_1 = arith.constant 0 : index
    %3 = vector.load %arg2[%c0, %c0_1] : memref<128x128xf32, #tpu.memory_space<vmem>>, vector<128x128xf32>
    %c0_2 = arith.constant 0 : index
    %c0_3 = arith.constant 0 : index
    %4 = vector.load %arg3[%c0_2, %c0_3] : memref<1x128xf32, #tpu.memory_space<vmem>>, vector<1x128xf32>
    %5 = vector.broadcast %4 : vector<1x128xf32> to vector<128x128xf32>
    %6 = arith.mulf %3, %5 : vector<128x128xf32>
    %c0_4 = arith.constant 0 : index
    %c0_5 = arith.constant 0 : index
    %7 = vector.load %arg6[%c0_4, %c0_5] : memref<128x128xf32, #tpu.memory_space<vmem>>, vector<128x128xf32>
    %8 = arith.addf %7, %6 : vector<128x128xf32>
    %c0_6 = arith.constant 0 : index
    %c0_7 = arith.constant 0 : index
    %9 = vector.load %arg6[%c0_6, %c0_7] : memref<128x128xf32, #tpu.memory_space<vmem>>, vector<128x128xf32>
    tpu.vector_store %arg6[%c0_6, %c0_7], %8 {strides = array<i32>} : memref<128x128xf32, #tpu.memory_space<vmem>>, vector<128x128xf32>,
    %c0_i32_8 = arith.constant 0 : i32
    %10 = arith.cmpi eq, %arg1, %c0_i32_8 : i32
    %11 = arith.extui %10 : i1 to i32
    %c0_i32_9 = arith.constant 0 : i32
    %12 = arith.cmpi ne, %11, %c0_i32_9 : i32
    scf.if %12 {
      %c0_10 = arith.constant 0 : index
      %c0_11 = arith.constant 0 : index
      %13 = vector.load %arg6[%c0_10, %c0_11] : memref<128x128xf32, #tpu.memory_space<vmem>>, vector<128x128xf32>
      %cst = arith.constant dense<0.000000e+00> : vector<128xf32>
      %14 = vector.multi_reduction <add>, %13, %cst [1] : vector<128x128xf32> to vector<128xf32>
      %15 = vector.shape_cast %14 : vector<128xf32> to vector<128x1xf32>
      %c0_12 = arith.constant 0 : index
      %c0_13 = arith.constant 0 : index
      %16 = memref.load %arg4[%c0_12, %c0_13] : memref<1x1xf32, #tpu.memory_space<smem>>
      %17 = vector.broadcast %16 : f32 to vector<128x1xf32>
      %18 = arith.addf %15, %17 : vector<128x1xf32>
      %19 = arith.negf %18 : vector<128x1xf32>
      %20 = math.exp %19 : vector<128x1xf32>
      %cst_14 = arith.constant 1.000000e+00 : f32
      %21 = vector.broadcast %cst_14 : f32 to vector<128x1xf32>
      %22 = arith.addf %21, %20 : vector<128x1xf32>
      %23 = arith.divf %21, %22 : vector<128x1xf32>
      %24 = vector.shape_cast %23 : vector<128x1xf32> to vector<128x1xf32>
      %25 = vector.broadcast %24 : vector<128x1xf32> to vector<128x128xf32>
      %c0_15 = arith.constant 0 : index
      %c0_16 = arith.constant 0 : index
      %26 = vector.load %arg5[%c0_15, %c0_16] : memref<128x128xf32, #tpu.memory_space<vmem>>, vector<128x128xf32>
      tpu.vector_store %arg5[%c0_15, %c0_16], %25 {strides = array<i32>} : memref<128x128xf32, #tpu.memory_space<vmem>>, vector<128x128xf32>,
    } else {
    }
    return
  }
  func.func @transform_0(%arg0: i32, %arg1: i32) -> (i32, i32) {
    %c0_i32 = arith.constant 0 : i32
    return %arg0, %arg1 : i32, i32
  }
  func.func @transform_1(%arg0: i32, %arg1: i32) -> (i32, i32) {
    %c0_i32 = arith.constant 0 : i32
    %c0_i32_0 = arith.constant 0 : i32
    return %c0_i32, %arg1 : i32, i32
  }
  func.func @transform_2(%arg0: i32, %arg1: i32) -> (i32, i32) {
    %c0_i32 = arith.constant 0 : i32
    %c0_i32_0 = arith.constant 0 : i32
    %c0_i32_1 = arith.constant 0 : i32
    return %c0_i32, %c0_i32_0 : i32, i32
  }
  func.func @transform_3(%arg0: i32, %arg1: i32) -> (i32, i32) {
    %c0_i32 = arith.constant 0 : i32
    %c0_i32_0 = arith.constant 0 : i32
    return %arg0, %c0_i32 : i32, i32
  }
}

</mosaic_0001>

<bundles_post_ra>
// kernel: logistic_forward.1
= control target key start
LH: loop header
LB: loop body
LE: loop exit
PB: predicated region body
PF: predicated region fallthrough
CT: control target
= control target key end

     0   :  { %s528_s0 = inlined_call_operand.vmem [shape: f32[128,128], index: 0, kind: input, shape index: {}]   ;;  %s529_s1 = inlined_call_operand.vmem [shape: f32[1,128], index: 1, kind: input, shape index: {}]   ;;  %s530_s2 = inlined_call_operand.<no memory space> [shape: f32[1,1], index: 2, kind: input, shape index: {}]   ;;  %s531_s3 = inlined_call_operand.vmem [shape: f32[128,128], index: 3, kind: output, shape index: {}]  }
   0x1   :  { %v37_v0 = vld [vmem:[%s528_s0 + $0x10] sm:$0xff]  ;;  %v307_v1 = vld [vmem:[%s529_s1] ss:$0 sm:$0xff]  ;;  %v38_v5 = vld [vmem:[%s528_s0 + $0x18] sm:$0xff]  ;;  %v462_v33 = vstv %s530_s2 }
   0x2   :  { %v35_v2 = vld [vmem:[%s528_s0] sm:$0xff]  ;;  %v60_v3 = vmul.f32 %v307_v1, %v37_v0  ;;  %v36_v6 = vld [vmem:[%s528_s0 + $0x8] sm:$0xff]  ;;  %v61_v7 = vmul.f32 %v307_v1, %v38_v5  ;;  %v42_v13 = vld [vmem:[%s528_s0 + $0x38] sm:$0xff] }
   0x3   :  { %v58_v4 = vmul.f32 %v307_v1, %v35_v2  ;;  %v59_v8 = vmul.f32 %v307_v1, %v36_v6  ;;  %v40_v9 = vld [vmem:[%s528_s0 + $0x28] sm:$0xff]  ;;  %v39_v10 = vld [vmem:[%s528_s0 + $0x20] sm:$0xff]  ;;  %v41_v14 = vld [vmem:[%s528_s0 + $0x30] sm:$0xff]  ;;  %v65_v15 = vmul.f32 %v307_v1, %v42_v13 }
   0x4   :  { %145 = vadd.xlane.f32.xlu1 %v60_v3  ;;  %v63_v11 = vmul.f32 %v307_v1, %v40_v9  ;;  %v62_v12 = vmul.f32 %v307_v1, %v39_v10  ;;  %v64_v16 = vmul.f32 %v307_v1, %v41_v14  ;;  %v44_v17 = vld [vmem:[%s528_s0 + $0x48] sm:$0xff]  ;;  %v43_v18 = vld [vmem:[%s528_s0 + $0x40] sm:$0xff]  ;;  %v46_v21 = vld [vmem:[%s528_s0 + $0x58] sm:$0xff] }
   0x5   :  { %141 = vadd.xlane.f32.xlu0 %v58_v4  ;;  %v67_v19 = vmul.f32 %v307_v1, %v44_v17  ;;  %v66_v20 = vmul.f32 %v307_v1, %v43_v18  ;;  %v45_v22 = vld [vmem:[%s528_s0 + $0x50] sm:$0xff]  ;;  %v69_v23 = vmul.f32 %v307_v1, %v46_v21  ;;  %v48_v25 = vld [vmem:[%s528_s0 + $0x68] sm:$0xff]  ;;  %v47_v26 = vld [vmem:[%s528_s0 + $0x60] sm:$0xff] }
   0x6   :  { %v68_v24 = vmul.f32 %v307_v1, %v45_v22  ;;  %v71_v27 = vmul.f32 %v307_v1, %v48_v25  ;;  %v70_v28 = vmul.f32 %v307_v1, %v47_v26  ;;  %v50_v29 = vld [vmem:[%s528_s0 + $0x78] sm:$0xff]  ;;  %v49_v30 = vld [vmem:[%s528_s0 + $0x70] sm:$0xff] }
   0x7   :  { %v73_v31 = vmul.f32 %v307_v1, %v50_v29  ;;  %v72_v32 = vmul.f32 %v307_v1, %v49_v30 }
   0x8   :  { %147 = vadd.xlane.f32.xlu1 %v61_v7 }
   0x9   :  { %143 = vadd.xlane.f32.xlu0 %v59_v8 }
   0xc   :  { %151 = vadd.xlane.f32.xlu1 %v63_v11 }
   0xd   :  { %149 = vadd.xlane.f32.xlu0 %v62_v12 }
  0x10   :  { %155 = vadd.xlane.f32.xlu1 %v65_v15 }
  0x11   :  { %153 = vadd.xlane.f32.xlu0 %v64_v16 }
  0x14   :  { %159 = vadd.xlane.f32.xlu1 %v67_v19 }
  0x15   :  { %157 = vadd.xlane.f32.xlu0 %v66_v20 }
  0x18   :  { %163 = vadd.xlane.f32.xlu1 %v69_v23 }
  0x19   :  { %161 = vadd.xlane.f32.xlu0 %v68_v24 }
  0x1c   :  { %167 = vadd.xlane.f32.xlu1 %v71_v27 }
  0x1d   :  { %165 = vadd.xlane.f32.xlu0 %v70_v28 }
  0x20   :  { %171 = vadd.xlane.f32.xlu1 %v73_v31 }
  0x21   :  { %169 = vadd.xlane.f32.xlu0 %v72_v32 }
  0x91   :  { %v146_v34 = vpop.xlane.xlu1 %145 }
  0x92   :  { %v142_v35 = vpop.xlane.xlu0 %141  ;;  %v177_v36 = vadd.f32 %v462_v33, %v146_v34 }
  0x93   :  { %v175_v37 = vadd.f32 %v462_v33, %v142_v35 }
  0x94   :  { %v310_v38 = vmul.f32 -1.442695, %v177_v36 }
  0x95   :  { %v308_v39 = vmul.f32 -1.442695, %v175_v37  ;;  %v148_v40 = vpop.xlane.xlu1 %147 }
  0x96   :  { %v144_v41 = vpop.xlane.xlu0 %143  ;;  %324 = vpow2.f32 %v310_v38  ;;  %v178_v42 = vadd.f32 %v462_v33, %v148_v40 }
  0x97   :  { %v176_v43 = vadd.f32 %v462_v33, %v144_v41  ;;  %326 = vpow2.f32 %v308_v39 }
  0x98   :  { %v311_v44 = vmul.f32 -1.442695, %v178_v42 }
  0x99   :  { %v309_v45 = vmul.f32 -1.442695, %v176_v43  ;;  %v152_v46 = vpop.xlane.xlu1 %151 }
  0x9a   :  { %v150_v47 = vpop.xlane.xlu0 %149  ;;  %328 = vpow2.f32 %v311_v44  ;;  %v180_v48 = vadd.f32 %v462_v33, %v152_v46 }
  0x9b   :  { %v179_v49 = vadd.f32 %v462_v33, %v150_v47  ;;  %330 = vpow2.f32 %v309_v45 }
  0x9c   :  { %v313_v50 = vmul.f32 -1.442695, %v180_v48 }
  0x9d   :  { %v312_v51 = vmul.f32 -1.442695, %v179_v49  ;;  %v156_v52 = vpop.xlane.xlu1 %155 }
  0x9e   :  { %v154_v53 = vpop.xlane.xlu0 %153  ;;  %332 = vpow2.f32 %v313_v50  ;;  %v182_v54 = vadd.f32 %v462_v33, %v156_v52 }
  0x9f   :  { %v181_v55 = vadd.f32 %v462_v33, %v154_v53  ;;  %334 = vpow2.f32 %v312_v51 }
  0xa0   :  { %v325_v56 = vpop.eup %324  ;;  %v315_v57 = vmul.f32 -1.442695, %v182_v54 }
  0xa1   :  { %v327_v58 = vpop.eup %326  ;;  %v241_v59 = vadd.f32 1.0, %v325_v56  ;;  %v314_v60 = vmul.f32 -1.442695, %v181_v55  ;;  %v160_v61 = vpop.xlane.xlu1 %159 }
  0xa2   :  { %v158_v62 = vpop.xlane.xlu0 %157  ;;  %v239_v63 = vadd.f32 1.0, %v327_v58  ;;  %336 = vpow2.f32 %v315_v57  ;;  %v184_v0 = vadd.f32 %v462_v33, %v160_v61 }
  0xa3   :  { %v183_v1 = vadd.f32 %v462_v33, %v158_v62  ;;  %338 = vrcp.f32 %v241_v59 }
  0xa4   :  { %v329_v2 = vpop.eup %328  ;;  %340 = vrcp.f32 %v239_v63  ;;  %v317_v3 = vmul.f32 -1.442695, %v184_v0 }
  0xa5   :  { %v331_v4 = vpop.eup %330  ;;  %v242_v5 = vadd.f32 1.0, %v329_v2  ;;  %342 = vpow2.f32 %v314_v60  ;;  %v316_v6 = vmul.f32 -1.442695, %v183_v1  ;;  %v164_v7 = vpop.xlane.xlu1 %163 }
  0xa6   :  { %v162_v8 = vpop.xlane.xlu0 %161  ;;  %v240_v9 = vadd.f32 1.0, %v331_v4  ;;  %344 = vpow2.f32 %v317_v3  ;;  %v186_v10 = vadd.f32 %v462_v33, %v164_v7 }
  0xa7   :  { %v185_v11 = vadd.f32 %v462_v33, %v162_v8  ;;  %346 = vrcp.f32 %v242_v5 }
  0xa8   :  { %v333_v12 = vpop.eup %332  ;;  %348 = vrcp.f32 %v240_v9  ;;  %v319_v13 = vmul.f32 -1.442695, %v186_v10 }
  0xa9   :  { %v335_v14 = vpop.eup %334  ;;  %v244_v15 = vadd.f32 1.0, %v333_v12  ;;  %350 = vpow2.f32 %v316_v6  ;;  %v318_v16 = vmul.f32 -1.442695, %v185_v11  ;;  %v168_v17 = vpop.xlane.xlu1 %167 }
  0xaa   :  { %v166_v18 = vpop.xlane.xlu0 %165  ;;  %v243_v19 = vadd.f32 1.0, %v335_v14  ;;  %352 = vpow2.f32 %v319_v13  ;;  %v188_v20 = vadd.f32 %v462_v33, %v168_v17 }
  0xab   :  { %v187_v21 = vadd.f32 %v462_v33, %v166_v18  ;;  %354 = vrcp.f32 %v244_v15 }
  0xac   :  { %v337_v22 = vpop.eup %336  ;;  %356 = vrcp.f32 %v243_v19  ;;  %v321_v23 = vmul.f32 -1.442695, %v188_v20 }
  0xad   :  { %v320_v24 = vmul.f32 -1.442695, %v187_v21  ;;  %v339_v25 = vpop.eup %338  ;;  %v246_v26 = vadd.f32 1.0, %v337_v22  ;;  %358 = vpow2.f32 %v318_v16  ;;  %v172_v27 = vpop.xlane.xlu1 %171 }
  0xae   :  { %v170_v28 = vpop.xlane.xlu0 %169  ;;  %v341_v29 = vpop.eup %340  ;;  %289 = vst [vmem:[%s531_s3 + $0x10] sm:$0xff] %v339_v25  ;;  %360 = vpow2.f32 %v321_v23  ;;  %v190_v30 = vadd.f32 %v462_v33, %v172_v27 }
  0xaf   :  { %v189_v31 = vadd.f32 %v462_v33, %v170_v28  ;;  %v343_v32 = vpop.eup %342  ;;  %287 = vst [vmem:[%s531_s3] sm:$0xff] %v341_v29  ;;  %362 = vrcp.f32 %v246_v26 }
  0xb0   :  { %v345_v34 = vpop.eup %344  ;;  %v245_v35 = vadd.f32 1.0, %v343_v32  ;;  %364 = vpow2.f32 %v320_v24  ;;  %v323_v36 = vmul.f32 -1.442695, %v190_v30 }
  0xb1   :  { %v347_v37 = vpop.eup %346  ;;  %v248_v38 = vadd.f32 1.0, %v345_v34  ;;  %v322_v39 = vmul.f32 -1.442695, %v189_v31 }
  0xb2   :  { %v349_v40 = vpop.eup %348  ;;  %290 = vst [vmem:[%s531_s3 + $0x18] sm:$0xff] %v347_v37  ;;  %366 = vrcp.f32 %v245_v35 }
  0xb3   :  { %v351_v33 = vpop.eup %350  ;;  %288 = vst [vmem:[%s531_s3 + $0x8] sm:$0xff] %v349_v40  ;;  %368 = vrcp.f32 %v248_v38 }
  0xb4   :  { %v353_v41 = vpop.eup %352  ;;  %v247_v42 = vadd.f32 1.0, %v351_v33  ;;  %370 = vpow2.f32 %v323_v36 }
  0xb5   :  { %v355_v43 = vpop.eup %354  ;;  %v250_v44 = vadd.f32 1.0, %v353_v41  ;;  %372 = vpow2.f32 %v322_v39 }
  0xb6   :  { %v357_v45 = vpop.eup %356  ;;  %292 = vst [vmem:[%s531_s3 + $0x28] sm:$0xff] %v355_v43  ;;  %374 = vrcp.f32 %v247_v42 }
  0xb7   :  { %v359_v46 = vpop.eup %358  ;;  %291 = vst [vmem:[%s531_s3 + $0x20] sm:$0xff] %v357_v45  ;;  %376 = vrcp.f32 %v250_v44 }
  0xb8   :  { %v361_v47 = vpop.eup %360  ;;  %v249_v48 = vadd.f32 1.0, %v359_v46 }
  0xb9   :  { %v363_v49 = vpop.eup %362  ;;  %v252_v50 = vadd.f32 1.0, %v361_v47 }
  0xba   :  { %v365_v51 = vpop.eup %364  ;;  %294 = vst [vmem:[%s531_s3 + $0x38] sm:$0xff] %v363_v49  ;;  %378 = vrcp.f32 %v249_v48 }
  0xbb   :  { %380 = vrcp.f32 %v252_v50  ;;  %v251_v52 = vadd.f32 1.0, %v365_v51 }
  0xbc   :  { %v367_v53 = vpop.eup %366 }
  0xbd   :  { %v369_v54 = vpop.eup %368  ;;  %293 = vst [vmem:[%s531_s3 + $0x30] sm:$0xff] %v367_v53  ;;  %382 = vrcp.f32 %v251_v52 }
  0xbe   :  { %v371_v55 = vpop.eup %370  ;;  %296 = vst [vmem:[%s531_s3 + $0x48] sm:$0xff] %v369_v54 }
  0xbf   :  { %v373_v56 = vpop.eup %372  ;;  %v254_v57 = vadd.f32 1.0, %v371_v55 }
  0xc0   :  { %v375_v58 = vpop.eup %374  ;;  %v253_v59 = vadd.f32 1.0, %v373_v56 }
  0xc1   :  { %v377_v60 = vpop.eup %376  ;;  %295 = vst [vmem:[%s531_s3 + $0x40] sm:$0xff] %v375_v58  ;;  %384 = vrcp.f32 %v254_v57 }
  0xc2   :  { %298 = vst [vmem:[%s531_s3 + $0x58] sm:$0xff] %v377_v60  ;;  %386 = vrcp.f32 %v253_v59 }
  0xc4   :  { %v379_v61 = vpop.eup %378 }
  0xc5   :  { %v381_v62 = vpop.eup %380  ;;  %297 = vst [vmem:[%s531_s3 + $0x50] sm:$0xff] %v379_v61 }
  0xc6   :  { %300 = vst [vmem:[%s531_s3 + $0x68] sm:$0xff] %v381_v62 }
  0xc7   :  { %v383_v63 = vpop.eup %382 }
  0xc8   :  { %299 = vst [vmem:[%s531_s3 + $0x60] sm:$0xff] %v383_v63 }
  0xcb   :  { %v385_v0 = vpop.eup %384 }
  0xcc   :  { %v387_v1 = vpop.eup %386  ;;  %302 = vst [vmem:[%s531_s3 + $0x78] sm:$0xff] %v385_v0 }
  0xcd   :  { %301 = vst [vmem:[%s531_s3 + $0x70] sm:$0xff] %v387_v1 }

</bundles_post_ra>
